<compile_context>
chip_gen: v7x
topology: tpu7x:2x2x1
jax: 0.10.0
libtpu: 0.0.40
codegen_flags: <defaults>
</compile_context>

<pallas_src>
import functools

import jax
import jax.numpy as jnp
from jax.experimental import pallas as pl
from jax.experimental.pallas import tpu as pltpu

LANE = 128
SUBLANE = 8


def _round_up(x, m):
    return (x + m - 1) // m * m


def _apply_act(x, ac_fn):
    if ac_fn == "relu":
        return jnp.maximum(x, 0.0)
    if ac_fn == "gelu":
        # PyTorch F.gelu default is the exact erf form (not the tanh approx).
        return jax.nn.gelu(x, approximate=False)
    if ac_fn == "mish":
        # Note: exp/log/tanh all go through the single EUP; fine for these
        # widths since the kernel is memory/latency bound, not EUP bound.
        return x * jnp.tanh(jax.nn.softplus(x))
    raise ValueError(f"unsupported activation: {ac_fn}")


def mlp_kernel(ac_fn, use_layernorm, n_layers, *refs):
    """refs = [x_tile, (ln_gamma, ln_beta)?, w0, b0, w1, b1, ..., out_tile]."""
    idx = 0
    x_ref = refs[idx]
    idx += 1
    out_ref = refs[-1]

    h = x_ref[...].astype(jnp.float32)

    if use_layernorm:
        gamma_ref = refs[idx]
        beta_ref = refs[idx + 1]
        idx += 2
        # Single reduction pass: var = E[x^2] - E[x]^2 (only 2 XLU units).
        mean = jnp.mean(h, axis=-1, keepdims=True)
        mean_sq = jnp.mean(h * h, axis=-1, keepdims=True)
        var = mean_sq - mean * mean
        h = (h - mean) * jax.lax.rsqrt(var + 1e-5)
        h = h * gamma_ref[...].astype(jnp.float32) + beta_ref[...].astype(jnp.float32)

    layer_refs = refs[idx:-1]
    for i in range(n_layers):
        w = layer_refs[2 * i][...]                        # bf16 (cast in wrapper)
        b = layer_refs[2 * i + 1][...].astype(jnp.float32)
        h = jnp.dot(h.astype(w.dtype), w, preferred_element_type=jnp.float32) + b
        if i < n_layers - 1:
            # TODO(synk): dropout omitted (eval mode / dropout_rate=0.0 default).
            h = _apply_act(h, ac_fn)

    out_ref[...] = h.astype(out_ref.dtype)


def prepare_params(params, compute_dtype=jnp.bfloat16, lane=LANE):
    """Zero-pad layer output widths to multiples of `lane` and cast weights once.

    The first layer keeps its true input width (x is not feature-padded, so
    LayerNorm statistics stay exact); every layer's output width is padded to
    a multiple of 128 so intermediate / final stores are lane-dense.
    """
    layers = params["layers"]
    padded = []
    prev_out_pad = layers[0][0].shape[0]          # true input width
    for w, b in layers:
        fin, fout = w.shape
        fout_pad = _round_up(fout, lane)
        w_p = (
            jnp.zeros((prev_out_pad, fout_pad), compute_dtype)
            .at[:fin, :fout]
            .set(w.astype(compute_dtype))
        )
        b_p = jnp.zeros((1, fout_pad), jnp.float32).at[:, :fout].set(b.astype(jnp.float32))
        padded.append((w_p, b_p))
        prev_out_pad = fout_pad
    prepared = {
        "layers": padded,
        "in_size": layers[0][0].shape[0],
        "out_size": layers[-1][0].shape[1],
    }
    if "ln_gamma" in params:
        prepared["ln_gamma"] = params["ln_gamma"].astype(jnp.float32)
        prepared["ln_beta"] = params["ln_beta"].astype(jnp.float32)
    return prepared


def _pick_batch_tile(batch, max_batch_tile):
    """Balance the batch tile across ceil(batch/max) grid steps.

    Keeps tiles <= max_batch_tile rows (VMEM-friendly, ~85% of HBM roofline at
    512 rows) while bounding padding waste to < SUBLANE rows per tile, instead
    of padding all the way up to a multiple of max_batch_tile.
    """
    pb = _round_up(batch, SUBLANE)
    n_tiles = -(-pb // max_batch_tile)            # ceil
    tb = _round_up(-(-pb // n_tiles), SUBLANE)    # balanced, sublane-aligned
    return tb


def mlp_forward(x, prepared, *, ac_fn="relu", use_layernorm=False, max_batch_tile=512):
    batch, in_size = x.shape
    assert in_size == prepared["in_size"]
    layers = prepared["layers"]
    out_size = prepared["out_size"]
    f_out_pad = layers[-1][0].shape[1]

    tb = _pick_batch_tile(batch, max_batch_tile)
    padded_batch = _round_up(batch, tb)
    if padded_batch != batch:
        x = jnp.pad(x, ((0, padded_batch - batch), (0, 0)))
    grid = (padded_batch // tb,)

    inputs = [x]
    in_specs = [pl.BlockSpec((tb, in_size), lambda i: (i, 0))]
    if use_layernorm:
        inputs += [prepared["ln_gamma"], prepared["ln_beta"]]
        in_specs += [
            pl.BlockSpec((1, in_size), lambda i: (0, 0)),
            pl.BlockSpec((1, in_size), lambda i: (0, 0)),
        ]
    for w, b in layers:
        inputs += [w, b]
        # Full-array blocks + constant index_map -> weights stay VMEM-resident.
        in_specs += [
            pl.BlockSpec(w.shape, lambda i: (0, 0)),
            pl.BlockSpec(b.shape, lambda i: (0, 0)),
        ]

    kernel = functools.partial(mlp_kernel, ac_fn, use_layernorm, len(layers))
    out = pl.pallas_call(
        kernel,
        out_shape=jax.ShapeDtypeStruct((padded_batch, f_out_pad), x.dtype),
        grid_spec=pltpu.PrefetchScalarGridSpec(
            num_scalar_prefetch=0,
            grid=grid,
            in_specs=in_specs,
            out_specs=pl.BlockSpec((tb, f_out_pad), lambda i: (i, 0)),
        ),
        compiler_params=pltpu.CompilerParams(dimension_semantics=("parallel",)),
    )(*inputs)
    return out[:batch, :out_size]


def init_params(key, input_size, hidden_sizes, output_size, use_layernorm):
    """Deterministic synthetic init (shapes match nn.Linear / nn.LayerNorm)."""
    params = {"layers": []}
    sizes = [input_size] + list(hidden_sizes) + [output_size]
    for i in range(len(sizes) - 1):
        key, kw, kb = jax.random.split(key, 3)
        fan_in, fan_out = sizes[i], sizes[i + 1]
        # Stored already transposed as (in, out) for x @ W in the kernel.
        w = jax.random.normal(kw, (fan_in, fan_out), jnp.float32) * (1.0 / jnp.sqrt(fan_in))
        b = jax.random.normal(kb, (1, fan_out), jnp.float32) * 0.01
        params["layers"].append((w, b))
    if use_layernorm:
        params["ln_gamma"] = jnp.ones((1, input_size), jnp.float32)
        params["ln_beta"] = jnp.zeros((1, input_size), jnp.float32)
    return params


def mlp_reference(x, params, *, ac_fn="relu", use_layernorm=False,
                  compute_dtype=jnp.bfloat16):
    """Plain-JAX reference replicating the PyTorch forward semantics with the
    same compute-dtype choice as the kernel (bf16 MXU inputs, f32 accum)."""
    h = x.astype(jnp.float32)
    if use_layernorm:
        mean = jnp.mean(h, axis=-1, keepdims=True)
        var = jnp.mean(h * h, axis=-1, keepdims=True) - mean * mean
        h = (h - mean) * jax.lax.rsqrt(var + 1e-5)
        h = h * params["ln_gamma"] + params["ln_beta"]
    n = len(params["layers"])
    for i, (w, b) in enumerate(params["layers"]):
        h = jnp.dot(h.astype(compute_dtype), w.astype(compute_dtype),
                    preferred_element_type=jnp.float32) + b
        if i < n - 1:
            h = _apply_act(h, ac_fn)
    return h.astype(x.dtype)


if __name__ == "__main__":
    # Module config: MLP(input_size=32, hidden_sizes=[64, 64], output_size=16,
    #                    ac_fn='relu', use_layernorm=True, dropout_rate=0.0)
    batch = 8
    input_size = 32
    hidden_sizes = [64, 64]
    output_size = 16
    ac_fn = "relu"
    use_layernorm = True

    key = jax.random.PRNGKey(0)
    kx, kp = jax.random.split(key)
    x = jax.random.normal(kx, (batch, input_size), jnp.float32)
    params = init_params(kp, input_size, hidden_sizes, output_size, use_layernorm)
    prepared = prepare_params(params, compute_dtype=jnp.bfloat16)

    out = mlp_forward(x, prepared, ac_fn=ac_fn, use_layernorm=use_layernorm)
    out = jax.block_until_ready(out)

    ref = mlp_reference(x, params, ac_fn=ac_fn, use_layernorm=use_layernorm)
    assert out.shape == (batch, output_size), out.shape
    assert jnp.allclose(out, ref, atol=2e-2, rtol=2e-2), "mismatch vs reference"

    print("KERNEL_OK")
</pallas_src>

<mosaic_0001>
module attributes {stable_mosaic.version = 11 : i64} {
  func.func @mlp_kernel(%arg0: i32, %arg1: memref<8x32xf32, #tpu.memory_space<vmem>>, %arg2: memref<1x32xf32, #tpu.memory_space<vmem>>, %arg3: memref<1x32xf32, #tpu.memory_space<vmem>>, %arg4: memref<32x128xbf16, #tpu.memory_space<vmem>>, %arg5: memref<1x128xf32, #tpu.memory_space<vmem>>, %arg6: memref<128x128xbf16, #tpu.memory_space<vmem>>, %arg7: memref<1x128xf32, #tpu.memory_space<vmem>>, %arg8: memref<128x128xbf16, #tpu.memory_space<vmem>>, %arg9: memref<1x128xf32, #tpu.memory_space<vmem>>, %arg10: memref<8x128xf32, #tpu.memory_space<vmem>>) attributes {dimension_semantics = [#tpu.dimension_semantics<parallel>], iteration_bounds = array<i64: 1>, scalar_prefetch = 0 : i64, scratch_operands = 0 : i64, tpu.core_type = #tpu.core_type<tc>, window_params = [{transform_indices = @transform_0, window_bounds = array<i64: 8, 32>}, {pipeline_mode = #tpu.pipeline_mode<synchronous>, transform_indices = @transform_1, window_bounds = array<i64: 1, 32>}, {pipeline_mode = #tpu.pipeline_mode<synchronous>, transform_indices = @transform_2, window_bounds = array<i64: 1, 32>}, {pipeline_mode = #tpu.pipeline_mode<synchronous>, transform_indices = @transform_3, window_bounds = array<i64: 32, 128>}, {pipeline_mode = #tpu.pipeline_mode<synchronous>, transform_indices = @transform_4, window_bounds = array<i64: 1, 128>}, {pipeline_mode = #tpu.pipeline_mode<synchronous>, transform_indices = @transform_5, window_bounds = array<i64: 128, 128>}, {pipeline_mode = #tpu.pipeline_mode<synchronous>, transform_indices = @transform_6, window_bounds = array<i64: 1, 128>}, {pipeline_mode = #tpu.pipeline_mode<synchronous>, transform_indices = @transform_7, window_bounds = array<i64: 128, 128>}, {pipeline_mode = #tpu.pipeline_mode<synchronous>, transform_indices = @transform_8, window_bounds = array<i64: 1, 128>}, {transform_indices = @transform_9, window_bounds = array<i64: 8, 128>}]} {
    %c0 = arith.constant 0 : index
    %c0_0 = arith.constant 0 : index
    %0 = vector.load %arg1[%c0, %c0_0] : memref<8x32xf32, #tpu.memory_space<vmem>>, vector<8x32xf32>
    %cst = arith.constant dense<0.000000e+00> : vector<8xf32>
    %1 = vector.multi_reduction <add>, %0, %cst [1] : vector<8x32xf32> to vector<8xf32>
    %2 = vector.shape_cast %1 : vector<8xf32> to vector<8x1xf32>
    %cst_1 = arith.constant 3.200000e+01 : f32
    %3 = vector.broadcast %cst_1 : f32 to vector<8x1xf32>
    %4 = arith.divf %2, %3 : vector<8x1xf32>
    %5 = arith.mulf %0, %0 : vector<8x32xf32>
    %cst_2 = arith.constant dense<0.000000e+00> : vector<8xf32>
    %6 = vector.multi_reduction <add>, %5, %cst_2 [1] : vector<8x32xf32> to vector<8xf32>
    %7 = vector.shape_cast %6 : vector<8xf32> to vector<8x1xf32>
    %cst_3 = arith.constant 3.200000e+01 : f32
    %8 = vector.broadcast %cst_3 : f32 to vector<8x1xf32>
    %9 = arith.divf %7, %8 : vector<8x1xf32>
    %10 = arith.mulf %4, %4 : vector<8x1xf32>
    %11 = arith.subf %9, %10 : vector<8x1xf32>
    %12 = vector.broadcast %4 : vector<8x1xf32> to vector<8x32xf32>
    %13 = arith.subf %0, %12 : vector<8x32xf32>
    %cst_4 = arith.constant 9.99999974E-6 : f32
    %14 = vector.broadcast %cst_4 : f32 to vector<8x1xf32>
    %15 = arith.addf %11, %14 : vector<8x1xf32>
    %16 = math.rsqrt %15 : vector<8x1xf32>
    %17 = vector.broadcast %16 : vector<8x1xf32> to vector<8x32xf32>
    %18 = arith.mulf %13, %17 : vector<8x32xf32>
    %c0_5 = arith.constant 0 : index
    %c0_6 = arith.constant 0 : index
    %19 = vector.load %arg2[%c0_5, %c0_6] : memref<1x32xf32, #tpu.memory_space<vmem>>, vector<1x32xf32>
    %20 = vector.broadcast %19 : vector<1x32xf32> to vector<8x32xf32>
    %21 = arith.mulf %18, %20 : vector<8x32xf32>
    %c0_7 = arith.constant 0 : index
    %c0_8 = arith.constant 0 : index
    %22 = vector.load %arg3[%c0_7, %c0_8] : memref<1x32xf32, #tpu.memory_space<vmem>>, vector<1x32xf32>
    %23 = vector.broadcast %22 : vector<1x32xf32> to vector<8x32xf32>
    %24 = arith.addf %21, %23 : vector<8x32xf32>
    %c0_9 = arith.constant 0 : index
    %c0_10 = arith.constant 0 : index
    %25 = vector.load %arg4[%c0_9, %c0_10] : memref<32x128xbf16, #tpu.memory_space<vmem>>, vector<32x128xbf16>
    %c0_11 = arith.constant 0 : index
    %c0_12 = arith.constant 0 : index
    %26 = vector.load %arg5[%c0_11, %c0_12] : memref<1x128xf32, #tpu.memory_space<vmem>>, vector<1x128xf32>
    %27 = arith.truncf %24 : vector<8x32xf32> to vector<8x32xbf16>
    %cst_13 = arith.constant dense<0.000000e+00> : vector<8x128xf32>
    %28 = tpu.matmul %27, %25, %cst_13 {dimension_numbers = #tpu.dot_dimension_numbers<[1], [0], [0], [1], [0, 0, 1, 1], [], []>} : vector<8x32xbf16>, vector<32x128xbf16>, vector<8x128xf32> -> vector<8x128xf32>
    %29 = vector.broadcast %26 : vector<1x128xf32> to vector<8x128xf32>
    %30 = arith.addf %28, %29 : vector<8x128xf32>
    %cst_14 = arith.constant 0.000000e+00 : f32
    %31 = vector.broadcast %cst_14 : f32 to vector<8x128xf32>
    %32 = arith.maximumf %30, %31 : vector<8x128xf32>
    %c0_15 = arith.constant 0 : index
    %c0_16 = arith.constant 0 : index
    %33 = vector.load %arg6[%c0_15, %c0_16] : memref<128x128xbf16, #tpu.memory_space<vmem>>, vector<128x128xbf16>
    %c0_17 = arith.constant 0 : index
    %c0_18 = arith.constant 0 : index
    %34 = vector.load %arg7[%c0_17, %c0_18] : memref<1x128xf32, #tpu.memory_space<vmem>>, vector<1x128xf32>
    %35 = arith.truncf %32 : vector<8x128xf32> to vector<8x128xbf16>
    %cst_19 = arith.constant dense<0.000000e+00> : vector<8x128xf32>
    %36 = tpu.matmul %35, %33, %cst_19 {dimension_numbers = #tpu.dot_dimension_numbers<[1], [0], [0], [1], [0, 0, 1, 1], [], []>} : vector<8x128xbf16>, vector<128x128xbf16>, vector<8x128xf32> -> vector<8x128xf32>
    %37 = vector.broadcast %34 : vector<1x128xf32> to vector<8x128xf32>
    %38 = arith.addf %36, %37 : vector<8x128xf32>
    %cst_20 = arith.constant 0.000000e+00 : f32
    %39 = vector.broadcast %cst_20 : f32 to vector<8x128xf32>
    %40 = arith.maximumf %38, %39 : vector<8x128xf32>
    %c0_21 = arith.constant 0 : index
    %c0_22 = arith.constant 0 : index
    %41 = vector.load %arg8[%c0_21, %c0_22] : memref<128x128xbf16, #tpu.memory_space<vmem>>, vector<128x128xbf16>
    %c0_23 = arith.constant 0 : index
    %c0_24 = arith.constant 0 : index
    %42 = vector.load %arg9[%c0_23, %c0_24] : memref<1x128xf32, #tpu.memory_space<vmem>>, vector<1x128xf32>
    %43 = arith.truncf %40 : vector<8x128xf32> to vector<8x128xbf16>
    %cst_25 = arith.constant dense<0.000000e+00> : vector<8x128xf32>
    %44 = tpu.matmul %43, %41, %cst_25 {dimension_numbers = #tpu.dot_dimension_numbers<[1], [0], [0], [1], [0, 0, 1, 1], [], []>} : vector<8x128xbf16>, vector<128x128xbf16>, vector<8x128xf32> -> vector<8x128xf32>
    %45 = vector.broadcast %42 : vector<1x128xf32> to vector<8x128xf32>
    %46 = arith.addf %44, %45 : vector<8x128xf32>
    %c0_26 = arith.constant 0 : index
    %c0_27 = arith.constant 0 : index
    %47 = vector.load %arg10[%c0_26, %c0_27] : memref<8x128xf32, #tpu.memory_space<vmem>>, vector<8x128xf32>
    tpu.vector_store %arg10[%c0_26, %c0_27], %46 {strides = array<i32>} : memref<8x128xf32, #tpu.memory_space<vmem>>, vector<8x128xf32>,
    return
  }
  func.func @transform_0(%arg0: i32) -> (i32, i32) {
    %c0_i32 = arith.constant 0 : i32
    %c0_i32_0 = arith.constant 0 : i32
    return %arg0, %c0_i32 : i32, i32
  }
  func.func @transform_1(%arg0: i32) -> (i32, i32) {
    %c0_i32 = arith.constant 0 : i32
    %c0_i32_0 = arith.constant 0 : i32
    %c0_i32_1 = arith.constant 0 : i32
    return %c0_i32, %c0_i32_0 : i32, i32
  }
  func.func @transform_2(%arg0: i32) -> (i32, i32) {
    %c0_i32 = arith.constant 0 : i32
    %c0_i32_0 = arith.constant 0 : i32
    %c0_i32_1 = arith.constant 0 : i32
    return %c0_i32, %c0_i32_0 : i32, i32
  }
  func.func @transform_3(%arg0: i32) -> (i32, i32) {
    %c0_i32 = arith.constant 0 : i32
    %c0_i32_0 = arith.constant 0 : i32
    %c0_i32_1 = arith.constant 0 : i32
    return %c0_i32, %c0_i32_0 : i32, i32
  }
  func.func @transform_4(%arg0: i32) -> (i32, i32) {
    %c0_i32 = arith.constant 0 : i32
    %c0_i32_0 = arith.constant 0 : i32
    %c0_i32_1 = arith.constant 0 : i32
    return %c0_i32, %c0_i32_0 : i32, i32
  }
  func.func @transform_5(%arg0: i32) -> (i32, i32) {
    %c0_i32 = arith.constant 0 : i32
    %c0_i32_0 = arith.constant 0 : i32
    %c0_i32_1 = arith.constant 0 : i32
    return %c0_i32, %c0_i32_0 : i32, i32
  }
  func.func @transform_6(%arg0: i32) -> (i32, i32) {
    %c0_i32 = arith.constant 0 : i32
    %c0_i32_0 = arith.constant 0 : i32
    %c0_i32_1 = arith.constant 0 : i32
    return %c0_i32, %c0_i32_0 : i32, i32
  }
  func.func @transform_7(%arg0: i32) -> (i32, i32) {
    %c0_i32 = arith.constant 0 : i32
    %c0_i32_0 = arith.constant 0 : i32
    %c0_i32_1 = arith.constant 0 : i32
    return %c0_i32, %c0_i32_0 : i32, i32
  }
  func.func @transform_8(%arg0: i32) -> (i32, i32) {
    %c0_i32 = arith.constant 0 : i32
    %c0_i32_0 = arith.constant 0 : i32
    %c0_i32_1 = arith.constant 0 : i32
    return %c0_i32, %c0_i32_0 : i32, i32
  }
  func.func @transform_9(%arg0: i32) -> (i32, i32) {
    %c0_i32 = arith.constant 0 : i32
    %c0_i32_0 = arith.constant 0 : i32
    return %arg0, %c0_i32 : i32, i32
  }
}

</mosaic_0001>

<bundles_post_ra>
// kernel: tpu_custom_call.1
= control target key start
LH: loop header
LB: loop body
LE: loop exit
PB: predicated region body
PF: predicated region fallthrough
CT: control target
= control target key end

     0   :  { %14 = vsyncpa [#allocation3], 0  ;;  %s842_s0 = inlined_call_operand.hbm [shape: f32[8,32], index: 0, kind: input, shape index: {}]   ;;  %s843_s1 = inlined_call_operand.vmem [shape: f32[1,32], index: 1, kind: input, shape index: {}]   ;;  %s844_s2 = inlined_call_operand.vmem [shape: f32[1,32], index: 2, kind: input, shape index: {}]   ;;  %s845_s3 = inlined_call_operand.hbm [shape: bf16[32,128], index: 3, kind: input, shape index: {}]   ;;  %s846_s4 = inlined_call_operand.vmem [shape: f32[1,128], index: 4, kind: input, shape index: {}]   ;;  %s847_s5 = inlined_call_operand.hbm [shape: bf16[128,128], index: 5, kind: input, shape index: {}]   ;;  %s848_s6 = inlined_call_operand.vmem [shape: f32[1,128], index: 6, kind: input, shape index: {}]   ;;  %s849_s7 = inlined_call_operand.hbm [shape: bf16[128,128], index: 7, kind: input, shape index: {}]   ;;  %s850_s8 = inlined_call_operand.vmem [shape: f32[1,128], index: 8, kind: input, shape index: {}]   ;;  %s851_s9 = inlined_call_operand.hbm [shape: f32[8,128], index: 9, kind: output, shape index: {}]  }
   0x1   :  { %15 = vsyncpa [#allocation6], 0 }
   0x2   :  { %16 = vsyncpa [#allocation9], 0 }
   0x3   :  { %17 = vsyncpa [#allocation4], 0  ;;  %s672_s30 = smov [#allocation5]   ;;  %s554_s13 = scalar_lea.hbm %s845_s3, 256 }
   0x4   :  { %s37_s10 = sshll.u32 %s672_s30, 4  ;;  %p555_p0 = scmp.ne.s32.totalorder %s845_s3, %s554_s13  ;;  %s38_s10 = int_to_ptr.vmem [resolvable:$true] %s37_s10 }
   0x5   :  { %p558_p1 = scmp.lt.u32.totalorder %s554_s13, %s845_s3 }
   0x7   :  { %p560_p2 = pnand %p558_p1, %p555_p0 }
   0x9   :  { %563 = shalt.err (!%p560_p2)
}
   0xa   :  { %s564_s18 = scalar_lea.vmem %s38_s10, 256  ;;  %p569_p4 = scmp.lt.s32.totalorder %s38_s10, %s38_s10 }
   0xb   :  { %p565_p3 = scmp.ne.s32.totalorder %s38_s10, %s564_s18  ;;  %p570_p5 = scmp.lt.s32.totalorder %s564_s18, %s564_s18 }
   0xd   :  { %p571_p6 = por %p570_p5, %p569_p4 }
   0xf   :  { %p572_p7 = pnand %p571_p6, %p565_p3 }
  0x11   :  { %575 = shalt.err (!%p572_p7)
}
  0x12   :  { %s673_s19 = smov 64   ;;  %s674_s20 = smov 4  }
  0x13   :  { %43 = dma.hbm_to_vmem [thread:$0]  %s845_s3, 256, %s38_s10, [#allocation6], %s673_s19, %s673_s19, %s674_s20  }
  0x14   :  { %s675_s23 = smov [#allocation2]   ;;  %s676_s25 = smov [#allocation7]  }
  0x15   :  { %s24_s24 = sshll.u32 %s675_s23, 4  ;;  %s51_s26 = sshll.u32 %s676_s25, 4  ;;  %s25_s24 = int_to_ptr.vmem [resolvable:$true] %s24_s24  ;;  %s52_s26 = int_to_ptr.vmem [resolvable:$true] %s51_s26 }
  0x16   :  { %s576_s29 = scalar_lea.hbm %s842_s0, 128 }
  0x17   :  { %p577_p8 = scmp.ne.s32.totalorder %s842_s0, %s576_s29  ;;  %p580_p9 = scmp.lt.u32.totalorder %s576_s29, %s842_s0 }
  0x19   :  { %p582_p10 = pnand %p580_p9, %p577_p8 }
  0x1b   :  { %585 = shalt.err (!%p582_p10)
}
  0x1c   :  { %s586_s3 = scalar_lea.vmem %s25_s24, 128  ;;  %p591_p12 = scmp.lt.s32.totalorder %s25_s24, %s25_s24 }
  0x1d   :  { %p587_p11 = scmp.ne.s32.totalorder %s25_s24, %s586_s3  ;;  %p592_p13 = scmp.lt.s32.totalorder %s586_s3, %s586_s3 }
  0x1f   :  { %p593_p0 = por %p592_p13, %p591_p12 }
  0x21   :  { %p594_p1 = pnand %p593_p0, %p587_p11 }
  0x23   :  { %597 = shalt.err (!%p594_p1)
}
  0x24   :  { %27 = dma.hbm_to_vmem [thread:$0]  %s842_s0, 128, %s25_s24, [#allocation3]  }
  0x25   :  { %s598_s17 = scalar_lea.hbm %s847_s5, 1024 }
  0x26   :  { %p599_p2 = scmp.ne.s32.totalorder %s847_s5, %s598_s17  ;;  %p602_p3 = scmp.lt.u32.totalorder %s598_s17, %s847_s5 }
  0x28   :  { %p604_p4 = pnand %p602_p3, %p599_p2 }
  0x2a   :  { %607 = shalt.err (!%p604_p4)
}
  0x2b   :  { %s608_s25 = scalar_lea.vmem %s52_s26, 1024  ;;  %p613_p6 = scmp.lt.s32.totalorder %s52_s26, %s52_s26 }
  0x2c   :  { %p609_p5 = scmp.ne.s32.totalorder %s52_s26, %s608_s25  ;;  %p614_p7 = scmp.lt.s32.totalorder %s608_s25, %s608_s25 }
  0x2e   :  { %p615_p8 = por %p614_p7, %p613_p6 }
  0x30   :  { %p616_p9 = pnand %p615_p8, %p609_p5 }
  0x32   :  { %619 = shalt.err (!%p616_p9)
}
  0x33   :  { %57 = dma.hbm_to_vmem [thread:$0]  %s847_s5, 1024, %s52_s26, [#allocation6], %s673_s19, %s673_s19, %s674_s20  }
  0x34   :  { %s677_s27 = smov [#allocation8]   ;;  %s620_s11 = scalar_lea.hbm %s849_s7, 1024 }
  0x35   :  { %s65_s28 = sshll.u32 %s677_s27, 4  ;;  %p621_p10 = scmp.ne.s32.totalorder %s849_s7, %s620_s11  ;;  %s66_s28 = int_to_ptr.vmem [resolvable:$true] %s65_s28 }
  0x36   :  { %p624_p11 = scmp.lt.u32.totalorder %s620_s11, %s849_s7 }
  0x38   :  { %p626_p12 = pnand %p624_p11, %p621_p10 }
  0x3a   :  { %629 = shalt.err (!%p626_p12)
}
  0x3b   :  { %s630_s14 = scalar_lea.vmem %s66_s28, 1024  ;;  %p635_p0 = scmp.lt.s32.totalorder %s66_s28, %s66_s28 }
  0x3c   :  { %p631_p13 = scmp.ne.s32.totalorder %s66_s28, %s630_s14  ;;  %p636_p1 = scmp.lt.s32.totalorder %s630_s14, %s630_s14 }
  0x3e   :  { %p637_p2 = por %p636_p1, %p635_p0 }
  0x40   :  { %p638_p3 = pnand %p637_p2, %p631_p13 }
  0x42   :  { %641 = shalt.err (!%p638_p3)
}
  0x43   :  { %71 = dma.hbm_to_vmem [thread:$0]  %s849_s7, 1024, %s66_s28, [#allocation9], %s673_s19, %s673_s19, %s674_s20  }
  0x44   :  { %664 = dma.done.wait [#allocation3], 128  }
  0x45   :  { %665 = vsyncadd [#allocation3], 4294967168 }
  0x46   :  { %666 = dma.done.wait [#allocation6], 1280  }
  0x47   :  { %667 = vsyncadd [#allocation6], 4294966016 }
  0x48   :  { %668 = dma.done.wait [#allocation9], 1024  }
  0x49   :  { %669 = vsyncadd [#allocation9], 4294966272  ;;  %vm88_vm0 = vcmask 261120   ;;  %v87_v0 = vld [vmem:[#allocation2] sm:$0xff]  ;;  %v534_v4 = vld [vmem:[#allocation5] sm:$0xff]   ;;  %v678_v5 = vmov 0.0  }
  0x4a   :  { %v89_v1 = vsel %vm88_vm0, %v87_v0, 0.0  ;;  %v94_v2 = vmul.f32 %v87_v0, %v87_v0  ;;  %477 = vmatprep.subr.bf16.mxu0 %v678_v5  ;;  %vm679_vm1 = vmmov 0   ;;  %v535_v6 = vld [vmem:[#allocation5 + $0x8] sm:$0xff]   ;;  %485 = vmatprep.subr.bf16.mxu1 %v678_v5  ;;  %v536_v7 = vld [vmem:[#allocation7] sm:$0xff]   ;;  %v537_v8 = vld [vmem:[#allocation7 + $0x8] sm:$0xff]   ;;  %s680_s21 = smov [#allocation10]  }
  0x4b   :  { %90 = vadd.xlane.f32.xlu0 %v89_v1  ;;  %481 = vmatprep.mubr.msk.bf16.mxu0 %vm679_vm1, %v678_v5  ;;  %v538_v9 = vld [vmem:[#allocation7 + $0x10] sm:$0xff]   ;;  %v539_v10 = vld [vmem:[#allocation7 + $0x18] sm:$0xff]   ;;  %v540_v11 = vld [vmem:[#allocation7 + $0x20] sm:$0xff]   ;;  %s421_s22 = sshll.u32 %s680_s21, 4  ;;  %s422_s22 = int_to_ptr.vmem [resolvable:$true] %s421_s22 }
  0x4c   :  { %v95_v3 = vsel %vm88_vm0, %v94_v2, 0.0  ;;  %478 = vmatpush3.bf16.msra.mxu0 %v534_v4  ;;  %501 = vmatprep.mubr.msk.bf16.mxu1 %vm679_vm1, %v678_v5  ;;  %v541_v12 = vld [vmem:[#allocation7 + $0x28] sm:$0xff]   ;;  %v542_v28 = vld [vmem:[#allocation7 + $0x30] sm:$0xff]   ;;  %v543_v29 = vld [vmem:[#allocation7 + $0x38] sm:$0xff]   ;;  %p647_p5 = scmp.lt.s32.totalorder %s422_s22, %s422_s22 }
  0x4d   :  { %479 = vmatprep.subr.bf16.mxu0 %v678_v5  ;;  %486 = vmatpush3.bf16.msra.mxu1 %v536_v7  ;;  %v432_v22 = vld [vmem:[%s843_s1] ss:$0 sm:$0xff]  ;;  %v544_v30 = vld [vmem:[#allocation8] sm:$0xff]   ;;  %v546_v32 = vld [vmem:[#allocation8 + $0x10] sm:$0xff]  }
  0x4e   :  { %487 = vmatprep.subr.bf16.mxu1 %v678_v5  ;;  %v433_v24 = vld [vmem:[%s844_s2] ss:$0 sm:$0xff]  ;;  %v547_v33 = vld [vmem:[#allocation8 + $0x18] sm:$0xff]   ;;  %v548_v34 = vld [vmem:[#allocation8 + $0x20] sm:$0xff]  }
  0x4f   :  { %96 = vadd.xlane.f32.xlu0 %v95_v3  ;;  %v545_v31 = vld [vmem:[#allocation8 + $0x8] sm:$0xff]   ;;  %v550_v44 = vld [vmem:[#allocation8 + $0x30] sm:$0xff]   ;;  %v551_v45 = vld [vmem:[#allocation8 + $0x38] sm:$0xff]  }
  0x50   :  { %480 = vmatpush3.bf16.msra.mxu0 %v535_v6  ;;  %v549_v35 = vld [vmem:[#allocation8 + $0x28] sm:$0xff]  }
  0x51   :  { %505 = vmatprep.subr.bf16.mxu0 %v678_v5  ;;  %488 = vmatpush3.bf16.msra.mxu1 %v537_v8  ;;  %v434_v36 = vld [vmem:[%s846_s4] ss:$0 sm:$0xff] }
  0x52   :  { %489 = vmatprep.subr.bf16.mxu1 %v678_v5  ;;  %v438_v46 = vld [vmem:[%s848_s6] ss:$0 sm:$0xff]  ;;  %s642_s6 = scalar_lea.vmem %s422_s22, 128 }
  0x53   :  { %v447_v54 = vld [vmem:[%s850_s8] ss:$0 sm:$0xff]  ;;  %p643_p4 = scmp.ne.s32.totalorder %s422_s22, %s642_s6  ;;  %p648_p6 = scmp.lt.s32.totalorder %s642_s6, %s642_s6 }
  0x55   :  { %490 = vmatpush3.bf16.msra.mxu1 %v538_v9  ;;  %p649_p7 = por %p648_p6, %p647_p5 }
  0x56   :  { %491 = vmatprep.subr.bf16.mxu1 %v678_v5 }
  0x57   :  { %p650_p8 = pnand %p649_p7, %p643_p4 }
  0x59   :  { %492 = vmatpush3.bf16.msra.mxu1 %v539_v10 }
  0x5a   :  { %493 = vmatprep.subr.bf16.mxu1 %v678_v5 }
  0x5d   :  { %494 = vmatpush3.bf16.msra.mxu1 %v540_v11 }
  0x5e   :  { %495 = vmatprep.subr.bf16.mxu1 %v678_v5 }
  0x61   :  { %496 = vmatpush3.bf16.msra.mxu1 %v541_v12 }
  0x62   :  { %497 = vmatprep.subr.bf16.mxu1 %v678_v5 }
  0x65   :  { %498 = vmatpush3.bf16.msra.mxu1 %v542_v28 }
  0x66   :  { %499 = vmatprep.subr.bf16.mxu1 %v678_v5 }
  0x69   :  { %500 = vmatpush3.bf16.msra.mxu1 %v543_v29 }
  0xd8   :  { %v91_v13 = vpop.xlane.xlu0 %90 }
  0xd9   :  { %v93_v14 = vmul.f32 0.03125, %v91_v13 }
  0xdb   :  { %v99_v16 = vmul.f32 %v93_v14, %v93_v14  ;;  %v101_v20 = vsub.f32 %v87_v0, %v93_v14 }
  0xdc   :  { %v97_v15 = vpop.xlane.xlu0 %96 }
  0xdd   :  { %v98_v17 = vmul.f32 0.03125, %v97_v15 }
  0xdf   :  { %v100_v18 = vsub.f32 %v98_v17, %v99_v16 }
  0xe1   :  { %v102_v19 = vadd.f32 1e-05, %v100_v18 }
  0xe3   :  { %552 = vrsqrt.f32 %v102_v19 }
  0xed   :  { %v553_v21 = vpop.eup %552 }
  0xee   :  { %v104_v23 = vmul.f32 %v553_v21, %v101_v20 }
  0xf0   :  { %v112_v25 = vmul.f32 %v432_v22, %v104_v23 }
  0xf2   :  { %v120_v26 = vadd.f32 %v433_v24, %v112_v25 }
  0xf4   :  { %v126_v27 = vpack.c.bf16 %v120_v26, %v120_v26 }
  0xf6   :  { %482 = vmatmul.mubr.msk.bf16.vlgmr.msra.gmra.mrb[0].mxu0 %vm88_vm0, %v126_v27 }
  0xf7   :  { %521 = vmatprep.mubr.msk.bf16.mxu0 %vm679_vm1, %v678_v5  ;;  %506 = vmatpush3.bf16.msra.mxu0 %v544_v30 }
  0xf8   :  { %507 = vmatprep.subr.bf16.mxu0 %v678_v5 }
  0xfb   :  { %508 = vmatpush3.bf16.msra.mxu0 %v545_v31 }
  0xfc   :  { %509 = vmatprep.subr.bf16.mxu0 %v678_v5 }
  0xff   :  { %510 = vmatpush3.bf16.msra.mxu0 %v546_v32 }
 0x100   :  { %511 = vmatprep.subr.bf16.mxu0 %v678_v5 }
 0x103   :  { %512 = vmatpush3.bf16.msra.mxu0 %v547_v33 }
 0x104   :  { %513 = vmatprep.subr.bf16.mxu0 %v678_v5 }
 0x107   :  { %514 = vmatpush3.bf16.msra.mxu0 %v548_v34 }
 0x108   :  { %515 = vmatprep.subr.bf16.mxu0 %v678_v5 }
 0x10b   :  { %516 = vmatpush3.bf16.msra.mxu0 %v549_v35 }
 0x10c   :  { %517 = vmatprep.subr.bf16.mxu0 %v678_v5 }
 0x10f   :  { %518 = vmatpush3.bf16.msra.mxu0 %v550_v44 }
 0x110   :  { %519 = vmatprep.subr.bf16.mxu0 %v678_v5 }
 0x113   :  { %520 = vmatpush3.bf16.msra.mxu0 %v551_v45 }
 0x1c9   :  { %v182_v37 = vpop.f32.mrb[0].mxu0 }
 0x1ca   :  { %v183_v38 = vadd.f32 %v434_v36, %v182_v37  ;;  %v483_v39 = vpop.f32.mrb[1].mxu0 }
 0x1cb   :  { %v185_v40 = vpop.f32.mrb[2].mxu0 }
 0x1cc   :  { %v188_v41 = vmax.f32 %v183_v38, 0.0  ;;  %v484_v42 = vpop.f32.mrb[3].mxu0 }
 0x1ce   :  { %v206_v43 = vpack.c.bf16 %v188_v41, %v188_v41 }
 0x1d0   :  { %502 = vmatmul.mubr.bf16.vlgmr.msra.gmra.mrb[0].mxu1 %v206_v43 }
 0x2a3   :  { %v295_v47 = vpop.f32.mrb[0].mxu1 }
 0x2a4   :  { %v296_v48 = vadd.f32 %v438_v46, %v295_v47  ;;  %v503_v49 = vpop.f32.mrb[1].mxu1 }
 0x2a5   :  { %v298_v50 = vpop.f32.mrb[2].mxu1 }
 0x2a6   :  { %v301_v51 = vmax.f32 %v296_v48, 0.0  ;;  %v504_v52 = vpop.f32.mrb[3].mxu1 }
 0x2a8   :  { %v319_v53 = vpack.c.bf16 %v301_v51, %v301_v51 }
 0x2aa   :  { %522 = vmatmul.mubr.bf16.vlgmr.msra.gmra.mrb[4].mxu0 %v319_v53 }
 0x37d   :  { %v408_v55 = vpop.f32.mrb[4].mxu0 }
 0x37e   :  { %v409_v56 = vadd.f32 %v447_v54, %v408_v55  ;;  %v523_v57 = vpop.f32.mrb[5].mxu0 }
 0x37f   :  { %v411_v58 = vpop.f32.mrb[6].mxu0 }
 0x380   :  { %414 = vst [vmem:[#allocation10] sm:$0xff] %v409_v56  ;;  %v524_v59 = vpop.f32.mrb[7].mxu0 }
 0x381   :  { %653 = shalt.err (!%p650_p8)
}
 0x382   :  { %s654_s8 = scalar_lea.hbm %s851_s9, 128 }
 0x383   :  { %p655_p9 = scmp.ne.s32.totalorder %s851_s9, %s654_s8  ;;  %p658_p10 = scmp.lt.u32.totalorder %s654_s8, %s851_s9 }
 0x385   :  { %p660_p11 = pnand %p658_p10, %p655_p9 }
 0x387   :  { %663 = shalt.err (!%p660_p11)
}
 0x388   :  { %424 = dma.vmem_to_hbm [thread:$0]  %s422_s22, 128, %s851_s9, [#allocation4]  }
 0x389   :  { %670 = dma.done.wait [#allocation4], 128  }
 0x38a   :  { %671 = vsyncadd [#allocation4], 4294967168 }
 0x38b   :  { %428 = vsyncpa [#allocation3], 1 }
 0x38c   :  { %429 = vsyncpa [#allocation6], 1 }
 0x38d   :  { %430 = vsyncpa [#allocation9], 1 }
 0x38e   :  { %431 = vsyncpa [#allocation4], 1 }

</bundles_post_ra>
